<compile_context>
chip_gen: v5e
topology: v5e:2x2
jax: 0.10.0
libtpu: 0.0.40
codegen_flags: <defaults>
</compile_context>

<pallas_src>
import functools

import jax
import jax.numpy as jnp
import numpy as np
from jax import lax
from jax.experimental import pallas as pl
from jax.experimental.pallas import tpu as pltpu

NUM_CLASSES = 10
OC = 4                    # conv out channels
KHW = 4                   # kernel taps (2*2)
OHW = 64                  # conv output spatial (8*8)
FEAT = OC * OHW           # 256 = CHW-flattened feature width
N_PAD = 128               # lane-padded logit width


def dummy_model_kernel(patches_ref, w_conv_ref, b_conv_ref, w_fc_ref, b_fc_ref, out_ref):
    # Conv2d(1,4,k=2,s=4): one MXU matmul producing a CHW-ordered, lane-dense (bm, 256) slab.
    h = jnp.dot(patches_ref[...], w_conv_ref[...], preferred_element_type=jnp.float32)
    # Bias + ReLU as full-width VPU ops on the (bm, 256) slab.
    h = jnp.maximum(h + b_conv_ref[...], 0.0)
    # Linear(256 -> 10): single MXU matmul (K=256), N padded to 128 -> unmasked stores.
    out_ref[...] = jnp.dot(h, w_fc_ref[...], preferred_element_type=jnp.float32) + b_fc_ref[...]


def pack_params(conv_w, conv_b, fc_w, fc_b):
    """One-time weight re-layout (run once at model init, NOT per forward call)."""
    conv_w_km = conv_w.reshape(OC, KHW).T.astype(jnp.float32)              # (4, 4) [tap, oc]
    w_conv = jnp.kron(conv_w_km, jnp.eye(OHW, dtype=jnp.float32))          # (256, 256)
    b_conv = jnp.repeat(conv_b.astype(jnp.float32), OHW).reshape(1, FEAT)  # (1, 256)
    w_fc = jnp.zeros((FEAT, N_PAD), jnp.float32).at[:, :NUM_CLASSES].set(
        fc_w.astype(jnp.float32).T)                                        # (256, 128)
    b_fc = jnp.zeros((1, N_PAD), jnp.float32).at[0, :NUM_CLASSES].set(
        fc_b.astype(jnp.float32))                                          # (1, 128)
    return w_conv, b_conv, w_fc, b_fc


def extract_patches(x):
    """im2col for k=2, stride=4 on NCHW (B,1,32,32) -> (B, 256), column = k*64 + s."""
    xs = x[:, 0]                                                          # (B, 32, 32)
    taps = [xs[:, kh::4, kw::4] for kh in range(2) for kw in range(2)]    # 4 x (B, 8, 8)
    return jnp.stack(taps, axis=1).reshape(x.shape[0], KHW * OHW)         # tap-major


def _round_up(a, b):
    return (a + b - 1) // b * b


@functools.partial(jax.jit, static_argnames=("bm",))
def dummy_model_forward(x, w_conv, b_conv, w_fc, b_fc, *, bm=2048):
    """x: (B,1,32,32) f32. w_conv/b_conv/w_fc/b_fc: packed weights from pack_params()."""
    B = x.shape[0]
    patches = extract_patches(x).astype(jnp.float32)                      # (B, 256)

    # Batch tiling: pad only to a multiple of 8 sublanes, then split into balanced tiles.
    B8 = _round_up(B, 8)
    num_tiles = pl.cdiv(B8, bm)
    # Ensure >=2 grid steps when there is enough work, so "parallel" shards across the
    # two TensorCores on v7x (negligible extra step overhead on 1-TC chips).
    if num_tiles == 1 and B8 >= 512:
        num_tiles = 2
    bm_eff = _round_up(pl.cdiv(B8, num_tiles), 8)
    B_pad = bm_eff * num_tiles
    if B_pad != B:
        patches = jnp.pad(patches, ((0, B_pad - B), (0, 0)))

    grid_spec = pltpu.PrefetchScalarGridSpec(
        num_scalar_prefetch=0,
        grid=(num_tiles,),
        in_specs=[
            pl.BlockSpec((bm_eff, FEAT), lambda i: (i, 0)),   # patches: streamed over batch
            pl.BlockSpec((FEAT, FEAT), lambda i: (0, 0)),     # conv weight: resident (const block)
            pl.BlockSpec((1, FEAT), lambda i: (0, 0)),        # conv bias:   resident
            pl.BlockSpec((FEAT, N_PAD), lambda i: (0, 0)),    # fc weight:   resident
            pl.BlockSpec((1, N_PAD), lambda i: (0, 0)),       # fc bias:     resident
        ],
        out_specs=pl.BlockSpec((bm_eff, N_PAD), lambda i: (i, 0)),
    )
    out = pl.pallas_call(
        dummy_model_kernel,
        out_shape=jax.ShapeDtypeStruct((B_pad, N_PAD), jnp.float32),
        grid_spec=grid_spec,
        compiler_params=pltpu.CompilerParams(
            dimension_semantics=("parallel",),
            vmem_limit_bytes=32 * 1024 * 1024,
        ),
    )(patches, w_conv, b_conv, w_fc, b_fc)
    # Note: torch forward's `print(x.shape)` is a host-side debug side effect; omitted.
    return out[:B, :NUM_CLASSES]


def reference_forward(x, conv_w, conv_b, fc_w, fc_b):
    """Pure-JAX reference matching the PyTorch forward exactly (true-f32 precision)."""
    y = lax.conv_general_dilated(
        x, conv_w, window_strides=(4, 4), padding="VALID",
        dimension_numbers=("NCHW", "OIHW", "NCHW"),
        precision=lax.Precision.HIGHEST)
    y = y + conv_b.reshape(1, OC, 1, 1)
    y = jnp.maximum(y, 0.0)                       # (B, 4, 8, 8)
    y = y.reshape(x.shape[0], -1)                 # CHW flatten, (B, 256)
    return jnp.dot(y, fc_w.T, precision=lax.Precision.HIGHEST) + fc_b


if __name__ == "__main__":
    key = jax.random.PRNGKey(0)
    k_x, k_cw, k_cb, k_fw, k_fb = jax.random.split(key, 5)

    B = 2
    # Input consistent with Linear(4*8*8): NCHW (B, 1, 32, 32)
    x = jax.random.normal(k_x, (B, 1, 32, 32), dtype=jnp.float32)

    # Deterministic parameter init (PyTorch-default-style uniform bounds).
    conv_fan_in = 1 * 2 * 2
    conv_bound = 1.0 / np.sqrt(conv_fan_in)
    conv_w = jax.random.uniform(k_cw, (OC, 1, 2, 2), jnp.float32, -conv_bound, conv_bound)
    conv_b = jax.random.uniform(k_cb, (OC,), jnp.float32, -conv_bound, conv_bound)

    fc_fan_in = OC * 8 * 8
    fc_bound = 1.0 / np.sqrt(fc_fan_in)
    fc_w = jax.random.uniform(k_fw, (NUM_CLASSES, fc_fan_in), jnp.float32, -fc_bound, fc_bound)
    fc_b = jax.random.uniform(k_fb, (NUM_CLASSES,), jnp.float32, -fc_bound, fc_bound)

    # One-time weight packing (hoisted out of the per-call forward path).
    packed = pack_params(conv_w, conv_b, fc_w, fc_b)
    packed = jax.block_until_ready(packed)

    out = dummy_model_forward(x, *packed)
    out = jax.block_until_ready(out)

    ref = jax.block_until_ready(reference_forward(x, conv_w, conv_b, fc_w, fc_b))
    np.testing.assert_allclose(np.asarray(out), np.asarray(ref), rtol=1e-5, atol=1e-5)

    print("KERNEL_OK")
</pallas_src>

<mosaic_0001>
module attributes {stable_mosaic.version = 11 : i64} {
  func.func @dummy_model_kernel(%arg0: i32, %arg1: memref<8x256xf32, #tpu.memory_space<vmem>>, %arg2: memref<256x256xf32, #tpu.memory_space<vmem>>, %arg3: memref<1x256xf32, #tpu.memory_space<vmem>>, %arg4: memref<256x128xf32, #tpu.memory_space<vmem>>, %arg5: memref<1x128xf32, #tpu.memory_space<vmem>>, %arg6: memref<8x128xf32, #tpu.memory_space<vmem>>) attributes {dimension_semantics = [#tpu.dimension_semantics<parallel>], iteration_bounds = array<i64: 1>, scalar_prefetch = 0 : i64, scratch_operands = 0 : i64, tpu.core_type = #tpu.core_type<tc>, window_params = [{transform_indices = @transform_0, window_bounds = array<i64: 8, 256>}, {pipeline_mode = #tpu.pipeline_mode<synchronous>, transform_indices = @transform_1, window_bounds = array<i64: 256, 256>}, {pipeline_mode = #tpu.pipeline_mode<synchronous>, transform_indices = @transform_2, window_bounds = array<i64: 1, 256>}, {pipeline_mode = #tpu.pipeline_mode<synchronous>, transform_indices = @transform_3, window_bounds = array<i64: 256, 128>}, {pipeline_mode = #tpu.pipeline_mode<synchronous>, transform_indices = @transform_4, window_bounds = array<i64: 1, 128>}, {transform_indices = @transform_5, window_bounds = array<i64: 8, 128>}]} {
    %c0 = arith.constant 0 : index
    %c0_0 = arith.constant 0 : index
    %0 = vector.load %arg1[%c0, %c0_0] : memref<8x256xf32, #tpu.memory_space<vmem>>, vector<8x256xf32>
    %c0_1 = arith.constant 0 : index
    %c0_2 = arith.constant 0 : index
    %1 = vector.load %arg2[%c0_1, %c0_2] : memref<256x256xf32, #tpu.memory_space<vmem>>, vector<256x256xf32>
    %cst = arith.constant dense<0.000000e+00> : vector<8x256xf32>
    %2 = tpu.matmul %0, %1, %cst {dimension_numbers = #tpu.dot_dimension_numbers<[1], [0], [0], [1], [0, 0, 1, 1], [], []>} : vector<8x256xf32>, vector<256x256xf32>, vector<8x256xf32> -> vector<8x256xf32>
    %c0_3 = arith.constant 0 : index
    %c0_4 = arith.constant 0 : index
    %3 = vector.load %arg3[%c0_3, %c0_4] : memref<1x256xf32, #tpu.memory_space<vmem>>, vector<1x256xf32>
    %4 = vector.broadcast %3 : vector<1x256xf32> to vector<8x256xf32>
    %5 = arith.addf %2, %4 : vector<8x256xf32>
    %cst_5 = arith.constant 0.000000e+00 : f32
    %6 = vector.broadcast %cst_5 : f32 to vector<8x256xf32>
    %7 = arith.maximumf %5, %6 : vector<8x256xf32>
    %c0_6 = arith.constant 0 : index
    %c0_7 = arith.constant 0 : index
    %8 = vector.load %arg4[%c0_6, %c0_7] : memref<256x128xf32, #tpu.memory_space<vmem>>, vector<256x128xf32>
    %cst_8 = arith.constant dense<0.000000e+00> : vector<8x128xf32>
    %9 = tpu.matmul %7, %8, %cst_8 {dimension_numbers = #tpu.dot_dimension_numbers<[1], [0], [0], [1], [0, 0, 1, 1], [], []>} : vector<8x256xf32>, vector<256x128xf32>, vector<8x128xf32> -> vector<8x128xf32>
    %c0_9 = arith.constant 0 : index
    %c0_10 = arith.constant 0 : index
    %10 = vector.load %arg5[%c0_9, %c0_10] : memref<1x128xf32, #tpu.memory_space<vmem>>, vector<1x128xf32>
    %11 = vector.broadcast %10 : vector<1x128xf32> to vector<8x128xf32>
    %12 = arith.addf %9, %11 : vector<8x128xf32>
    %c0_11 = arith.constant 0 : index
    %c0_12 = arith.constant 0 : index
    %13 = vector.load %arg6[%c0_11, %c0_12] : memref<8x128xf32, #tpu.memory_space<vmem>>, vector<8x128xf32>
    tpu.vector_store %arg6[%c0_11, %c0_12], %12 {strides = array<i32>} : memref<8x128xf32, #tpu.memory_space<vmem>>, vector<8x128xf32>,
    return
  }
  func.func @transform_0(%arg0: i32) -> (i32, i32) {
    %c0_i32 = arith.constant 0 : i32
    %c0_i32_0 = arith.constant 0 : i32
    return %arg0, %c0_i32 : i32, i32
  }
  func.func @transform_1(%arg0: i32) -> (i32, i32) {
    %c0_i32 = arith.constant 0 : i32
    %c0_i32_0 = arith.constant 0 : i32
    %c0_i32_1 = arith.constant 0 : i32
    return %c0_i32, %c0_i32_0 : i32, i32
  }
  func.func @transform_2(%arg0: i32) -> (i32, i32) {
    %c0_i32 = arith.constant 0 : i32
    %c0_i32_0 = arith.constant 0 : i32
    %c0_i32_1 = arith.constant 0 : i32
    return %c0_i32, %c0_i32_0 : i32, i32
  }
  func.func @transform_3(%arg0: i32) -> (i32, i32) {
    %c0_i32 = arith.constant 0 : i32
    %c0_i32_0 = arith.constant 0 : i32
    %c0_i32_1 = arith.constant 0 : i32
    return %c0_i32, %c0_i32_0 : i32, i32
  }
  func.func @transform_4(%arg0: i32) -> (i32, i32) {
    %c0_i32 = arith.constant 0 : i32
    %c0_i32_0 = arith.constant 0 : i32
    %c0_i32_1 = arith.constant 0 : i32
    return %c0_i32, %c0_i32_0 : i32, i32
  }
  func.func @transform_5(%arg0: i32) -> (i32, i32) {
    %c0_i32 = arith.constant 0 : i32
    %c0_i32_0 = arith.constant 0 : i32
    return %arg0, %c0_i32 : i32, i32
  }
}

</mosaic_0001>

<bundles_post_ra>
// kernel: dummy_model_forward.1
= control target key start
LH: loop header
LB: loop body
LE: loop exit
PB: predicated region body
PF: predicated region fallthrough
CT: control target
= control target key end

     0   :  { %10 = vsyncpa [#allocation3], 0  ;;  %s302_s21 = smov [#allocation2]   ;;  %s303_s23 = smov 256   ;;  %s449_s0 = inlined_call_operand.vmem [shape: f32[8,256], index: 0, kind: input, shape index: {}]   ;;  %s450_s1 = inlined_call_operand.hbm [shape: f32[256,256], index: 1, kind: input, shape index: {}]   ;;  %s451_s2 = inlined_call_operand.vmem [shape: f32[1,256], index: 2, kind: input, shape index: {}]   ;;  %s452_s3 = inlined_call_operand.vmem [shape: f32[256,128], index: 3, kind: input, shape index: {}]   ;;  %s453_s4 = inlined_call_operand.vmem [shape: f32[1,128], index: 4, kind: input, shape index: {}]   ;;  %s454_s5 = inlined_call_operand.vmem [shape: f32[8,128], index: 5, kind: output, shape index: {}]  }
   0x1   :  { %s17_s20 = sshll.u32 %s450_s1, 4  ;;  %s19_s22 = sshll.u32 %s302_s21, 4  ;;  %s18_s20 = int_to_ptr.hbm [resolvable:$true] %s17_s20  ;;  %s20_s22 = int_to_ptr.vmem [resolvable:$true] %s19_s22 }
   0x2   :  { %s304_s24 = smov 16  }
   0x3   :  { %25 = dma.hbm_to_vmem [thread:$0]  %s18_s20, 8192, %s20_s22, [#allocation3], %s303_s23, %s303_s23, %s304_s24  }
   0x4   :  { %300 = dma.done.wait [#allocation3], 8192  }
   0x5   :  { %301 = vsyncadd [#allocation3], 4294959104  ;;  %v69_v0 = vld [vmem:[#allocation2 + $0xf8] sm:$0xff]  ;;  %v67_v1 = vld [vmem:[#allocation2 + $0xe8] sm:$0xff] }
   0x6   :  { %v101_v2 = vld [vmem:[#allocation2 + $0x1f8] sm:$0xff]  ;;  %148 = vmatpush.msra.mxu2 %v69_v0  ;;  %v68_v3 = vld [vmem:[#allocation2 + $0xf0] sm:$0xff]  ;;  %v99_v4 = vld [vmem:[#allocation2 + $0x1e8] sm:$0xff] }
   0x7   :  { %168 = vmatpush.msra.mxu3 %v101_v2  ;;  %108 = vmatpush.msra.mxu0 %v68_v3  ;;  %v65_v5 = vld [vmem:[#allocation2 + $0xd8] sm:$0xff]  ;;  %v66_v6 = vld [vmem:[#allocation2 + $0xe0] sm:$0xff]  ;;  %v100_v7 = vld [vmem:[#allocation2 + $0x1f0] sm:$0xff] }
   0x8   :  { %149 = vmatpush.msra.mxu2 %v67_v1  ;;  %v97_v8 = vld [vmem:[#allocation2 + $0x1d8] sm:$0xff]  ;;  %v64_v9 = vld [vmem:[#allocation2 + $0xd0] sm:$0xff]  ;;  %v98_v10 = vld [vmem:[#allocation2 + $0x1e0] sm:$0xff]  ;;  %128 = vmatpush.msra.mxu1 %v100_v7 }
   0x9   :  { %169 = vmatpush.msra.mxu3 %v99_v4  ;;  %109 = vmatpush.msra.mxu0 %v66_v6  ;;  %v63_v11 = vld [vmem:[#allocation2 + $0xc8] sm:$0xff]  ;;  %v62_v13 = vld [vmem:[#allocation2 + $0xc0] sm:$0xff]  ;;  %v96_v14 = vld [vmem:[#allocation2 + $0x1d0] sm:$0xff] }
   0xa   :  { %v95_v12 = vld [vmem:[#allocation2 + $0x1c8] sm:$0xff]  ;;  %150 = vmatpush.msra.mxu2 %v65_v5  ;;  %129 = vmatpush.msra.mxu1 %v98_v10  ;;  %v61_v15 = vld [vmem:[#allocation2 + $0xb8] sm:$0xff]  ;;  %v60_v17 = vld [vmem:[#allocation2 + $0xb0] sm:$0xff] }
   0xb   :  { %170 = vmatpush.msra.mxu3 %v97_v8  ;;  %110 = vmatpush.msra.mxu0 %v64_v9  ;;  %v93_v16 = vld [vmem:[#allocation2 + $0x1b8] sm:$0xff]  ;;  %v94_v18 = vld [vmem:[#allocation2 + $0x1c0] sm:$0xff]  ;;  %v59_v19 = vld [vmem:[#allocation2 + $0xa8] sm:$0xff] }
   0xc   :  { %151 = vmatpush.msra.mxu2 %v63_v11  ;;  %130 = vmatpush.msra.mxu1 %v96_v14  ;;  %v91_v20 = vld [vmem:[#allocation2 + $0x1a8] sm:$0xff]  ;;  %v58_v21 = vld [vmem:[#allocation2 + $0xa0] sm:$0xff]  ;;  %v92_v22 = vld [vmem:[#allocation2 + $0x1b0] sm:$0xff] }
   0xd   :  { %171 = vmatpush.msra.mxu3 %v95_v12  ;;  %111 = vmatpush.msra.mxu0 %v62_v13  ;;  %v57_v23 = vld [vmem:[#allocation2 + $0x98] sm:$0xff]  ;;  %v56_v25 = vld [vmem:[#allocation2 + $0x90] sm:$0xff]  ;;  %v90_v26 = vld [vmem:[#allocation2 + $0x1a0] sm:$0xff] }
   0xe   :  { %152 = vmatpush.msra.mxu2 %v61_v15  ;;  %131 = vmatpush.msra.mxu1 %v94_v18  ;;  %v89_v24 = vld [vmem:[#allocation2 + $0x198] sm:$0xff]  ;;  %v55_v27 = vld [vmem:[#allocation2 + $0x88] sm:$0xff]  ;;  %v54_v29 = vld [vmem:[#allocation2 + $0x80] sm:$0xff] }
   0xf   :  { %172 = vmatpush.msra.mxu3 %v93_v16  ;;  %112 = vmatpush.msra.mxu0 %v60_v17  ;;  %v87_v28 = vld [vmem:[#allocation2 + $0x188] sm:$0xff]  ;;  %v88_v30 = vld [vmem:[#allocation2 + $0x190] sm:$0xff]  ;;  %v53_v31 = vld [vmem:[#allocation2 + $0x78] sm:$0xff] }
  0x10   :  { %153 = vmatpush.msra.mxu2 %v59_v19  ;;  %132 = vmatpush.msra.mxu1 %v92_v22  ;;  %v85_v32 = vld [vmem:[#allocation2 + $0x178] sm:$0xff]  ;;  %v52_v33 = vld [vmem:[#allocation2 + $0x70] sm:$0xff]  ;;  %v86_v34 = vld [vmem:[#allocation2 + $0x180] sm:$0xff] }
  0x11   :  { %173 = vmatpush.msra.mxu3 %v91_v20  ;;  %113 = vmatpush.msra.mxu0 %v58_v21  ;;  %v51_v35 = vld [vmem:[#allocation2 + $0x68] sm:$0xff]  ;;  %v50_v37 = vld [vmem:[#allocation2 + $0x60] sm:$0xff]  ;;  %v84_v38 = vld [vmem:[#allocation2 + $0x170] sm:$0xff] }
  0x12   :  { %154 = vmatpush.msra.mxu2 %v57_v23  ;;  %133 = vmatpush.msra.mxu1 %v90_v26  ;;  %v83_v36 = vld [vmem:[#allocation2 + $0x168] sm:$0xff]  ;;  %v49_v39 = vld [vmem:[#allocation2 + $0x58] sm:$0xff]  ;;  %v48_v41 = vld [vmem:[#allocation2 + $0x50] sm:$0xff] }
  0x13   :  { %174 = vmatpush.msra.mxu3 %v89_v24  ;;  %114 = vmatpush.msra.mxu0 %v56_v25  ;;  %v81_v40 = vld [vmem:[#allocation2 + $0x158] sm:$0xff]  ;;  %v82_v42 = vld [vmem:[#allocation2 + $0x160] sm:$0xff]  ;;  %v47_v43 = vld [vmem:[#allocation2 + $0x48] sm:$0xff] }
  0x14   :  { %155 = vmatpush.msra.mxu2 %v55_v27  ;;  %134 = vmatpush.msra.mxu1 %v88_v30  ;;  %v79_v44 = vld [vmem:[#allocation2 + $0x148] sm:$0xff]  ;;  %v46_v45 = vld [vmem:[#allocation2 + $0x40] sm:$0xff]  ;;  %v80_v46 = vld [vmem:[#allocation2 + $0x150] sm:$0xff] }
  0x15   :  { %175 = vmatpush.msra.mxu3 %v87_v28  ;;  %115 = vmatpush.msra.mxu0 %v54_v29  ;;  %v45_v47 = vld [vmem:[#allocation2 + $0x38] sm:$0xff]  ;;  %v44_v49 = vld [vmem:[#allocation2 + $0x30] sm:$0xff]  ;;  %v78_v50 = vld [vmem:[#allocation2 + $0x140] sm:$0xff] }
  0x16   :  { %156 = vmatpush.msra.mxu2 %v53_v31  ;;  %135 = vmatpush.msra.mxu1 %v86_v34  ;;  %v77_v48 = vld [vmem:[#allocation2 + $0x138] sm:$0xff]  ;;  %v43_v51 = vld [vmem:[#allocation2 + $0x28] sm:$0xff]  ;;  %v42_v53 = vld [vmem:[#allocation2 + $0x20] sm:$0xff] }
  0x17   :  { %176 = vmatpush.msra.mxu3 %v85_v32  ;;  %116 = vmatpush.msra.mxu0 %v52_v33  ;;  %v75_v52 = vld [vmem:[#allocation2 + $0x128] sm:$0xff]  ;;  %v76_v54 = vld [vmem:[#allocation2 + $0x130] sm:$0xff]  ;;  %v41_v55 = vld [vmem:[#allocation2 + $0x18] sm:$0xff] }
  0x18   :  { %157 = vmatpush.msra.mxu2 %v51_v35  ;;  %136 = vmatpush.msra.mxu1 %v84_v38  ;;  %v73_v56 = vld [vmem:[#allocation2 + $0x118] sm:$0xff]  ;;  %v40_v57 = vld [vmem:[#allocation2 + $0x10] sm:$0xff]  ;;  %v74_v58 = vld [vmem:[#allocation2 + $0x120] sm:$0xff] }
  0x19   :  { %177 = vmatpush.msra.mxu3 %v83_v36  ;;  %117 = vmatpush.msra.mxu0 %v50_v37  ;;  %v39_v59 = vld [vmem:[#allocation2 + $0x8] sm:$0xff]  ;;  %v36_v61 = vld [vmem:[%s449_s0] sm:$0xff]  ;;  %v72_v0 = vld [vmem:[#allocation2 + $0x110] sm:$0xff] }
  0x1a   :  { %158 = vmatpush.msra.mxu2 %v49_v39  ;;  %137 = vmatpush.msra.mxu1 %v82_v42  ;;  %v71_v60 = vld [vmem:[#allocation2 + $0x108] sm:$0xff]  ;;  %v38_v63 = vld [vmem:[#allocation2] sm:$0xff]  ;;  %v205_v2 = vld [vmem:[%s452_s3 + $0x78] sm:$0xff] }
  0x1b   :  { %178 = vmatpush.msra.mxu3 %v81_v40  ;;  %118 = vmatpush.msra.mxu0 %v48_v41  ;;  %v37_v62 = vld [vmem:[%s449_s0 + $0x8] sm:$0xff]  ;;  %v70_v1 = vld [vmem:[#allocation2 + $0x100] sm:$0xff]  ;;  %v204_v3 = vld [vmem:[%s452_s3 + $0x70] sm:$0xff] }
  0x1c   :  { %159 = vmatpush.msra.mxu2 %v47_v43  ;;  %138 = vmatpush.msra.mxu1 %v80_v46  ;;  %v221_v4 = vld [vmem:[%s452_s3 + $0xf8] sm:$0xff]  ;;  %v203_v5 = vld [vmem:[%s452_s3 + $0x68] sm:$0xff]  ;;  %v220_v6 = vld [vmem:[%s452_s3 + $0xf0] sm:$0xff] }
  0x1d   :  { %179 = vmatpush.msra.mxu3 %v79_v44  ;;  %119 = vmatpush.msra.mxu0 %v46_v45  ;;  %v202_v7 = vld [vmem:[%s452_s3 + $0x60] sm:$0xff]  ;;  %v219_v8 = vld [vmem:[%s452_s3 + $0xe8] sm:$0xff]  ;;  %v201_v9 = vld [vmem:[%s452_s3 + $0x58] sm:$0xff] }
  0x1e   :  { %160 = vmatpush.msra.mxu2 %v45_v47  ;;  %139 = vmatpush.msra.mxu1 %v78_v50  ;;  %v218_v10 = vld [vmem:[%s452_s3 + $0xe0] sm:$0xff]  ;;  %v200_v11 = vld [vmem:[%s452_s3 + $0x50] sm:$0xff]  ;;  %v217_v12 = vld [vmem:[%s452_s3 + $0xd8] sm:$0xff] }
  0x1f   :  { %180 = vmatpush.msra.mxu3 %v77_v48  ;;  %120 = vmatpush.msra.mxu0 %v44_v49  ;;  %v199_v13 = vld [vmem:[%s452_s3 + $0x48] sm:$0xff]  ;;  %v216_v14 = vld [vmem:[%s452_s3 + $0xd0] sm:$0xff]  ;;  %v198_v15 = vld [vmem:[%s452_s3 + $0x40] sm:$0xff] }
  0x20   :  { %161 = vmatpush.msra.mxu2 %v43_v51  ;;  %140 = vmatpush.msra.mxu1 %v76_v54  ;;  %v215_v16 = vld [vmem:[%s452_s3 + $0xc8] sm:$0xff]  ;;  %v197_v17 = vld [vmem:[%s452_s3 + $0x38] sm:$0xff]  ;;  %v214_v18 = vld [vmem:[%s452_s3 + $0xc0] sm:$0xff] }
  0x21   :  { %181 = vmatpush.msra.mxu3 %v75_v52  ;;  %121 = vmatpush.msra.mxu0 %v42_v53  ;;  %v196_v19 = vld [vmem:[%s452_s3 + $0x30] sm:$0xff]  ;;  %v213_v20 = vld [vmem:[%s452_s3 + $0xb8] sm:$0xff]  ;;  %v195_v21 = vld [vmem:[%s452_s3 + $0x28] sm:$0xff] }
  0x22   :  { %162 = vmatpush.msra.mxu2 %v41_v55  ;;  %141 = vmatpush.msra.mxu1 %v74_v58  ;;  %v212_v22 = vld [vmem:[%s452_s3 + $0xb0] sm:$0xff]  ;;  %v194_v23 = vld [vmem:[%s452_s3 + $0x20] sm:$0xff]  ;;  %v211_v24 = vld [vmem:[%s452_s3 + $0xa8] sm:$0xff] }
  0x23   :  { %182 = vmatpush.msra.mxu3 %v73_v56  ;;  %122 = vmatpush.msra.mxu0 %v40_v57  ;;  %v193_v25 = vld [vmem:[%s452_s3 + $0x18] sm:$0xff]  ;;  %v210_v26 = vld [vmem:[%s452_s3 + $0xa0] sm:$0xff]  ;;  %v192_v27 = vld [vmem:[%s452_s3 + $0x10] sm:$0xff] }
  0x24   :  { %163 = vmatpush.msra.mxu2 %v39_v59  ;;  %142 = vmatpush.msra.mxu1 %v72_v0  ;;  %v209_v28 = vld [vmem:[%s452_s3 + $0x98] sm:$0xff]  ;;  %v191_v29 = vld [vmem:[%s452_s3 + $0x8] sm:$0xff]  ;;  %v208_v30 = vld [vmem:[%s452_s3 + $0x90] sm:$0xff] }
  0x25   :  { %183 = vmatpush.msra.mxu3 %v71_v60  ;;  %164 = vmatmul.f32.vlgmr.msra.gmra.mxu2 %v36_v61  ;;  %v190_v31 = vld [vmem:[%s452_s3] sm:$0xff]  ;;  %v207_v32 = vld [vmem:[%s452_s3 + $0x88] sm:$0xff] }
  0x26   :  { %184 = vmatmul.f32.vlgmr.msra.gmra.mxu3 %v37_v62  ;;  %123 = vmatpush.msra.mxu0 %v38_v63  ;;  %v206_v33 = vld [vmem:[%s452_s3 + $0x80] sm:$0xff] }
  0x27   :  { %124 = vmatmul.f32.vlgmr.msra.gmra.mxu0 %v36_v61  ;;  %143 = vmatpush.msra.mxu1 %v70_v1  ;;  %v102_v34 = vld [vmem:[%s451_s2] sm:$0x3] }
  0x28   :  { %226 = vmatpush.msrb.mxu0 %v205_v2  ;;  %144 = vmatmul.f32.vlgmr.msra.gmra.mxu1 %v37_v62  ;;  %v104_v35 = vperm.slane %v102_v34, 0  ;;  %v105_v38 = vperm.slane %v102_v34, 1  ;;  %v275_v47 = vld [vmem:[%s453_s4] ss:$0 sm:$0xff] }
  0x29   :  { %246 = vmatpush.msrb.mxu1 %v221_v4 }
  0x2a   :  { %227 = vmatpush.msrb.mxu0 %v204_v3 }
  0x2b   :  { %247 = vmatpush.msrb.mxu1 %v220_v6 }
  0x2c   :  { %228 = vmatpush.msrb.mxu0 %v203_v5 }
  0x2d   :  { %248 = vmatpush.msrb.mxu1 %v219_v8 }
  0x2e   :  { %229 = vmatpush.msrb.mxu0 %v202_v7 }
  0x2f   :  { %249 = vmatpush.msrb.mxu1 %v218_v10 }
  0x30   :  { %230 = vmatpush.msrb.mxu0 %v201_v9 }
  0x31   :  { %250 = vmatpush.msrb.mxu1 %v217_v12 }
  0x32   :  { %231 = vmatpush.msrb.mxu0 %v200_v11 }
  0x33   :  { %251 = vmatpush.msrb.mxu1 %v216_v14 }
  0x34   :  { %232 = vmatpush.msrb.mxu0 %v199_v13 }
  0x35   :  { %252 = vmatpush.msrb.mxu1 %v215_v16 }
  0x36   :  { %233 = vmatpush.msrb.mxu0 %v198_v15 }
  0x37   :  { %253 = vmatpush.msrb.mxu1 %v214_v18 }
  0x38   :  { %234 = vmatpush.msrb.mxu0 %v197_v17 }
  0x39   :  { %254 = vmatpush.msrb.mxu1 %v213_v20 }
  0x3a   :  { %235 = vmatpush.msrb.mxu0 %v196_v19 }
  0x3b   :  { %255 = vmatpush.msrb.mxu1 %v212_v22 }
  0x3c   :  { %236 = vmatpush.msrb.mxu0 %v195_v21 }
  0x3d   :  { %256 = vmatpush.msrb.mxu1 %v211_v24 }
  0x3e   :  { %237 = vmatpush.msrb.mxu0 %v194_v23 }
  0x3f   :  { %257 = vmatpush.msrb.mxu1 %v210_v26 }
  0x40   :  { %238 = vmatpush.msrb.mxu0 %v193_v25 }
  0x41   :  { %258 = vmatpush.msrb.mxu1 %v209_v28 }
  0x42   :  { %239 = vmatpush.msrb.mxu0 %v192_v27 }
  0x43   :  { %259 = vmatpush.msrb.mxu1 %v208_v30 }
  0x44   :  { %240 = vmatpush.msrb.mxu0 %v191_v29 }
  0x45   :  { %260 = vmatpush.msrb.mxu1 %v207_v32 }
  0x46   :  { %241 = vmatpush.msrb.mxu0 %v190_v31 }
  0x47   :  { %261 = vmatpush.msrb.mxu1 %v206_v33 }
  0xa4   :  { %v125_v36 = vpop.f32.mrf.mxu0 }
  0xa5   :  { %v126_v37 = vadd.f32 %v125_v36, %v104_v35  ;;  %v145_v39 = vpop.f32.mrf.mxu1 }
  0xa7   :  { %v146_v40 = vadd.f32 %v145_v39, %v126_v37 }
  0xa8   :  { %v165_v41 = vpop.f32.mrf.mxu2 }
  0xa9   :  { %v185_v42 = vpop.f32.mrf.mxu3  ;;  %v188_v43 = vmax.f32 %v146_v40, 0.0  ;;  %v166_v44 = vadd.f32 %v165_v41, %v105_v38 }
  0xab   :  { %v186_v45 = vadd.f32 %v185_v42, %v166_v44  ;;  %242 = vmatmul.f32.vlgmr.msrb.gmra.mxu0 %v188_v43 }
  0xad   :  { %v189_v46 = vmax.f32 %v186_v45, 0.0 }
  0xaf   :  { %262 = vmatmul.f32.vlgmr.msrb.gmra.mxu1 %v189_v46 }
 0x128   :  { %v243_v48 = vpop.f32.mrf.mxu0 }
 0x129   :  { %v244_v49 = vadd.f32 %v275_v47, %v243_v48 }
 0x12c   :  { %v263_v50 = vpop.f32.mrf.mxu1 }
 0x12d   :  { %v264_v51 = vadd.f32 %v263_v50, %v244_v49 }
 0x12f   :  { %266 = vst [vmem:[%s454_s5] sm:$0xff] %v264_v51 }
 0x130   :  { %271 = vsyncpa [#allocation3], 1 }

</bundles_post_ra>
